<compile_context>
chip_gen: v6e
topology: v6e:2x2x1
jax: 0.10.0
libtpu: 0.0.40
codegen_flags: <defaults>
</compile_context>

<pallas_src>
import functools

import jax
import jax.numpy as jnp
from jax.experimental import pallas as pl
from jax.experimental.pallas import tpu as pltpu

BN_EPS = 1e-5
LANES = 128                      # every feature / hidden width padded to a full vreg of lanes
VMEM_LIMIT = 32 * 1024 * 1024    # scoped-VMEM budget, safe on v5e / v6e / v7x


def _round_up(x, m):
    return (x + m - 1) // m * m


def _pad2(x, rows, cols):
    x = x.astype(jnp.float32)
    return jnp.pad(x, ((0, rows - x.shape[0]), (0, cols - x.shape[1])))


# ----------------------------- Pallas kernels ------------------------------ #
def pool_mlp1_kernel(adj_ref, h_ref, w1_ref, b1_ref, scale_ref, shift_ref,
                     z1_ref, stats_ref, *, apply_act, n_valid, tile):
    """z1[i] = (sum_k adj[i,k] @ act(h[k])) @ W1 + b1, plus masked partial BN1 stats.

    adj is streamed as bf16 tiles (exact for 0/1); h is VMEM-resident and its contraction
    tile is activated (previous layer's BN+ReLU, fused lazily) then split hi/lo into two
    bf16 operands so the matmul uses the fast bf16 MXU path at ~f32 accuracy. The revisited
    z1 output block doubles as the f32 accumulator (no scratch).
    """
    i = pl.program_id(0)                 # hoisted: never call program_id inside pl.when
    k = pl.program_id(1)
    nk = pl.num_programs(1)

    @pl.when(k == 0)
    def _():
        z1_ref[...] = jnp.zeros_like(z1_ref)

    h = h_ref[pl.ds(k * tile, tile), :]
    if apply_act:
        h = jnp.maximum(h * scale_ref[...] + shift_ref[...], 0.0)
    h_hi = h.astype(jnp.bfloat16)
    h_lo = (h - h_hi.astype(jnp.float32)).astype(jnp.bfloat16)
    adj = adj_ref[...]
    z1_ref[...] += (jnp.dot(adj, h_hi, preferred_element_type=jnp.float32) +
                    jnp.dot(adj, h_lo, preferred_element_type=jnp.float32))

    @pl.when(k == nk - 1)
    def _():
        z1 = jnp.dot(z1_ref[...], w1_ref[...],
                     preferred_element_type=jnp.float32) + b1_ref[...]
        z1_ref[...] = z1
        row = i * tile + jax.lax.broadcasted_iota(jnp.int32, z1.shape, 0)
        mask = jnp.where(row < n_valid, 1.0, 0.0)
        zv = z1 * mask
        # TODO(synk): single-pass sum/sumsq can cancel when |mean| >> std; acceptable here.
        stats_ref[...] = jnp.concatenate(
            [jnp.sum(zv, axis=0, keepdims=True),
             jnp.sum(zv * z1, axis=0, keepdims=True)], axis=0)[None]


def bn_mlp2_kernel(z1_ref, scale1_ref, shift1_ref, w2_ref, b2_ref,
                   z2_ref, stats_ref, *, n_valid, tile):
    """Apply BN1+ReLU (precomputed scale/shift), z2 = a @ W2 + b2, masked partial BN2 stats."""
    i = pl.program_id(0)
    a = jnp.maximum(z1_ref[...] * scale1_ref[...] + shift1_ref[...], 0.0)
    z2 = jnp.dot(a, w2_ref[...], preferred_element_type=jnp.float32) + b2_ref[...]
    z2_ref[...] = z2
    row = i * tile + jax.lax.broadcasted_iota(jnp.int32, z2.shape, 0)
    mask = jnp.where(row < n_valid, 1.0, 0.0)
    zv = z2 * mask
    stats_ref[...] = jnp.concatenate(
        [jnp.sum(zv, axis=0, keepdims=True),
         jnp.sum(zv * z2, axis=0, keepdims=True)], axis=0)[None]


def pool_kernel(z_ref, scale_ref, shift_ref, gp_ref, out_ref):
    """h_pooled = graph_pool @ ReLU(BN(z)), K-tiled over nodes, accumulates into out_ref."""
    k = pl.program_id(0)

    @pl.when(k == 0)
    def _():
        out_ref[...] = jnp.zeros_like(out_ref)

    h = jnp.maximum(z_ref[...] * scale_ref[...] + shift_ref[...], 0.0)
    out_ref[...] += jnp.dot(gp_ref[...], h, preferred_element_type=jnp.float32)


def gather_concat_kernel(cand_ref, pooled_ref, scale_ref, shift_ref, z_ref, out_ref,
                         *, n_per_graph, n_j, n_pad, hid_pad):
    """torch.gather + concat: candidate rows picked from the VMEM-resident node features via a
    tiny per-graph one-hot matmul (no serialized per-row DMAs), final BN+ReLU applied only on
    the gathered rows, concat written as two lane-aligned slice stores."""
    b = pl.program_id(0)
    flat = cand_ref[0] + b * n_per_graph                          # (n_j, 1) int32
    cols = jax.lax.broadcasted_iota(jnp.int32, (n_j, n_pad), 1)
    onehot = (cols == flat).astype(jnp.float32)                   # (n_j, n_pad)
    rows = jnp.dot(onehot, z_ref[...], preferred_element_type=jnp.float32)
    cand_feat = jnp.maximum(rows * scale_ref[...] + shift_ref[...], 0.0)
    out_ref[0, :, 0:hid_pad] = cand_feat
    out_ref[0, :, hid_pad:2 * hid_pad] = jnp.broadcast_to(
        pooled_ref[pl.ds(b, 1), :], (n_j, hid_pad))


# ------------------------------ wrapper / glue ------------------------------ #
def _finalize_bn(stats, gamma, beta, n_valid):
    """Turn per-tile (sum, sumsq) partials into BN scale/shift (training-mode batch stats)."""
    s = jnp.sum(stats[:, 0, :], axis=0)
    ss = jnp.sum(stats[:, 1, :], axis=0)
    mean = s / n_valid
    var = jnp.maximum(ss / n_valid - mean * mean, 0.0)
    inv = jax.lax.rsqrt(var + BN_EPS)
    scale = gamma[0] * inv
    shift = beta[0] - mean * scale
    return scale[None, :], shift[None, :]


def feature_extractor_forward(adj, features, candidate, graph_pool, params,
                              n_j, n_m, *, tile=1024):
    N, f0 = features.shape
    B = graph_pool.shape[0]
    n_per_graph = n_j * n_m
    hid = params["layers"][-1]["w2"].shape[1]
    d_pad = LANES
    hid_pad = LANES
    assert f0 <= LANES and hid <= LANES

    if N <= tile:
        tile = max(_round_up(N, 16), 16)       # single tile covering all (padded) rows
    else:
        assert tile % 128 == 0, "tile must be a multiple of 128 when N > tile"
    n_pad = _round_up(N, tile)
    nt = n_pad // tile

    # adj entries are 0/1 (+ self loops): exact in bf16 -> halves the dominant HBM read.
    # TODO(synk): hoist this pad+cast out of the forward path when adj is static across calls.
    adj_p = jnp.pad(adj, ((0, n_pad - N), (0, n_pad - N))).astype(jnp.bfloat16)
    h = jnp.pad(features.astype(jnp.float32), ((0, n_pad - N), (0, d_pad - f0)))
    gp_p = jnp.pad(graph_pool.astype(jnp.float32), ((0, 0), (0, n_pad - N)))
    cand = candidate.astype(jnp.int32).reshape(B, n_j, 1)

    # Previous layer's BN+ReLU is applied lazily inside the consumer kernels; layer 0
    # consumes the raw (zero-padded) features with no activation.
    act_scale = jnp.ones((1, d_pad), jnp.float32)
    act_shift = jnp.zeros((1, d_pad), jnp.float32)
    apply_act = False

    for lp in params["layers"]:
        w1 = _pad2(lp["w1"], d_pad, hid_pad)
        b1 = _pad2(lp["b1"], 1, hid_pad)
        g1 = _pad2(lp["g1"], 1, hid_pad)
        be1 = _pad2(lp["be1"], 1, hid_pad)
        w2 = _pad2(lp["w2"], hid_pad, hid_pad)
        b2 = _pad2(lp["b2"], 1, hid_pad)
        g2 = _pad2(lp["g2"], 1, hid_pad)
        be2 = _pad2(lp["be2"], 1, hid_pad)

        z1, st1 = pl.pallas_call(
            functools.partial(pool_mlp1_kernel, apply_act=apply_act,
                              n_valid=N, tile=tile),
            grid=(nt, nt),
            in_specs=[
                pl.BlockSpec((tile, tile), lambda i, k: (i, k)),        # adj tile (bf16)
                pl.BlockSpec((n_pad, d_pad), lambda i, k: (0, 0)),      # h (VMEM-resident)
                pl.BlockSpec((d_pad, hid_pad), lambda i, k: (0, 0)),    # W1
                pl.BlockSpec((1, hid_pad), lambda i, k: (0, 0)),        # b1
                pl.BlockSpec((1, d_pad), lambda i, k: (0, 0)),          # prev BN scale
                pl.BlockSpec((1, d_pad), lambda i, k: (0, 0)),          # prev BN shift
            ],
            out_specs=(
                pl.BlockSpec((tile, hid_pad), lambda i, k: (i, 0)),     # z1 (= accumulator)
                pl.BlockSpec((1, 2, hid_pad), lambda i, k: (i, 0, 0)),  # partial BN1 stats
            ),
            out_shape=(jax.ShapeDtypeStruct((n_pad, hid_pad), jnp.float32),
                       jax.ShapeDtypeStruct((nt, 2, hid_pad), jnp.float32)),
            compiler_params=pltpu.CompilerParams(
                dimension_semantics=("parallel", "arbitrary"),
                vmem_limit_bytes=VMEM_LIMIT),
        )(adj_p, h, w1, b1, act_scale, act_shift)

        scale1, shift1 = _finalize_bn(st1, g1, be1, N)

        z2, st2 = pl.pallas_call(
            functools.partial(bn_mlp2_kernel, n_valid=N, tile=tile),
            grid=(nt,),
            in_specs=[
                pl.BlockSpec((tile, hid_pad), lambda i: (i, 0)),        # z1 tile
                pl.BlockSpec((1, hid_pad), lambda i: (0, 0)),           # BN1 scale
                pl.BlockSpec((1, hid_pad), lambda i: (0, 0)),           # BN1 shift
                pl.BlockSpec((hid_pad, hid_pad), lambda i: (0, 0)),     # W2
                pl.BlockSpec((1, hid_pad), lambda i: (0, 0)),           # b2
            ],
            out_specs=(
                pl.BlockSpec((tile, hid_pad), lambda i: (i, 0)),        # z2
                pl.BlockSpec((1, 2, hid_pad), lambda i: (i, 0, 0)),     # partial BN2 stats
            ),
            out_shape=(jax.ShapeDtypeStruct((n_pad, hid_pad), jnp.float32),
                       jax.ShapeDtypeStruct((nt, 2, hid_pad), jnp.float32)),
            compiler_params=pltpu.CompilerParams(
                dimension_semantics=("parallel",),
                vmem_limit_bytes=VMEM_LIMIT),
        )(z1, scale1, shift1, w2, b2)

        act_scale, act_shift = _finalize_bn(st2, g2, be2, N)
        apply_act = True
        h = z2

    z = h   # final node features; last BN2+ReLU is applied lazily in the consumers below

    h_pooled_p = pl.pallas_call(
        pool_kernel,
        grid=(nt,),
        in_specs=[
            pl.BlockSpec((tile, hid_pad), lambda k: (k, 0)),            # z tile
            pl.BlockSpec((1, hid_pad), lambda k: (0, 0)),               # final BN scale
            pl.BlockSpec((1, hid_pad), lambda k: (0, 0)),               # final BN shift
            pl.BlockSpec((B, tile), lambda k: (0, k)),                  # graph_pool K-tile
        ],
        out_specs=pl.BlockSpec((B, hid_pad), lambda k: (0, 0)),
        out_shape=jax.ShapeDtypeStruct((B, hid_pad), jnp.float32),
        compiler_params=pltpu.CompilerParams(
            dimension_semantics=("arbitrary",),
            vmem_limit_bytes=VMEM_LIMIT),
    )(z, act_scale, act_shift, gp_p)

    concat_p = pl.pallas_call(
        functools.partial(gather_concat_kernel, n_per_graph=n_per_graph,
                          n_j=n_j, n_pad=n_pad, hid_pad=hid_pad),
        grid=(B,),
        in_specs=[
            pl.BlockSpec((1, n_j, 1), lambda b: (b, 0, 0)),             # candidate indices
            pl.BlockSpec((B, hid_pad), lambda b: (0, 0)),               # h_pooled
            pl.BlockSpec((1, hid_pad), lambda b: (0, 0)),               # final BN scale
            pl.BlockSpec((1, hid_pad), lambda b: (0, 0)),               # final BN shift
            pl.BlockSpec((n_pad, hid_pad), lambda b: (0, 0)),           # z (VMEM-resident)
        ],
        out_specs=pl.BlockSpec((1, n_j, 2 * hid_pad), lambda b: (b, 0, 0)),
        out_shape=jax.ShapeDtypeStruct((B, n_j, 2 * hid_pad), jnp.float32),
        compiler_params=pltpu.CompilerParams(
            dimension_semantics=("parallel",),
            vmem_limit_bytes=VMEM_LIMIT),
    )(cand, h_pooled_p, act_scale, act_shift, z)

    # Strip the 128-lane padding (tiny XLA slice; kernels stay lane-dense).
    h_pooled = h_pooled_p[:, :hid]
    concat = jnp.concatenate(
        [concat_p[..., :hid], concat_p[..., hid_pad:hid_pad + hid]], axis=-1)
    return concat, h_pooled


# ------------------------------- pure-JAX ref ------------------------------- #
def _batchnorm_train(x, gamma, beta):
    mean = jnp.mean(x, axis=0, keepdims=True)
    var = jnp.mean((x - mean) ** 2, axis=0, keepdims=True)
    return (x - mean) * jax.lax.rsqrt(var + BN_EPS) * gamma + beta


def ref_forward(adj, features, candidate, graph_pool, params, n_j, n_m):
    h = features
    for lp in params["layers"]:
        pooled = adj @ h
        z = jnp.maximum(_batchnorm_train(pooled @ lp["w1"] + lp["b1"], lp["g1"], lp["be1"]), 0.0)
        z = z @ lp["w2"] + lp["b2"]
        h = jnp.maximum(_batchnorm_train(z, lp["g2"], lp["be2"]), 0.0)
    h_nodes = h
    h_pooled = graph_pool @ h_nodes
    B = candidate.shape[0]
    flat = candidate + jnp.arange(B, dtype=jnp.int32)[:, None] * (n_j * n_m)
    cand_feat = h_nodes[flat]
    concat = jnp.concatenate(
        [cand_feat, jnp.broadcast_to(h_pooled[:, None, :], cand_feat.shape)], axis=-1)
    return concat, h_pooled


def init_params(key, num_layers, input_dim, hidden_dim):
    layers = []
    d_in = input_dim
    for _ in range(num_layers - 1):
        key, k1, k2 = jax.random.split(key, 3)
        s1 = 1.0 / jnp.sqrt(d_in)
        s2 = 1.0 / jnp.sqrt(hidden_dim)
        layers.append(dict(
            w1=jax.random.uniform(k1, (d_in, hidden_dim), jnp.float32, -s1, s1),
            b1=jnp.zeros((1, hidden_dim), jnp.float32),
            g1=jnp.ones((1, hidden_dim), jnp.float32),
            be1=jnp.zeros((1, hidden_dim), jnp.float32),
            w2=jax.random.uniform(k2, (hidden_dim, hidden_dim), jnp.float32, -s2, s2),
            b2=jnp.zeros((1, hidden_dim), jnp.float32),
            g2=jnp.ones((1, hidden_dim), jnp.float32),
            be2=jnp.zeros((1, hidden_dim), jnp.float32),
        ))
        d_in = hidden_dim
    return {"layers": layers}


if __name__ == "__main__":
    def run_case(B, n_j, n_m, input_dim, hidden_dim, num_layers, tile, seed):
        N = B * n_j * n_m
        key = jax.random.PRNGKey(seed)
        kf, ka, kc, kp = jax.random.split(key, 4)

        features = jax.random.normal(kf, (N, input_dim), jnp.float32)
        rnd = jax.random.uniform(ka, (N, N), jnp.float32)
        adj = ((rnd + rnd.T) * 0.5 < 0.2).astype(jnp.float32) + jnp.eye(N, dtype=jnp.float32)
        adj = jnp.minimum(adj, 1.0)
        node_graph = jnp.arange(N) // (n_j * n_m)
        graph_pool = (node_graph[None, :] == jnp.arange(B)[:, None]).astype(jnp.float32) / (n_j * n_m)
        candidate = jax.random.randint(kc, (B, n_j), 0, n_j * n_m, jnp.int32)
        params = init_params(kp, num_layers, input_dim, hidden_dim)

        concat, h_pooled = feature_extractor_forward(
            adj, features, candidate, graph_pool, params, n_j, n_m, tile=tile)
        jax.block_until_ready((concat, h_pooled))

        ref_concat, ref_pooled = ref_forward(
            adj, features, candidate, graph_pool, params, n_j, n_m)
        assert concat.shape == (B, n_j, 2 * hidden_dim)
        assert h_pooled.shape == (B, hidden_dim)
        # hi/lo bf16 split keeps the adj matmul at ~f32 accuracy; tolerance covers the
        # remaining reassociation across the MXU accumulation + BN normalization.
        assert jnp.allclose(concat, ref_concat, rtol=2e-3, atol=2e-3)
        assert jnp.allclose(h_pooled, ref_pooled, rtol=2e-3, atol=2e-3)

    # small 4x4 JSSP instance -> single-tile path (N = 32)
    run_case(B=2, n_j=4, n_m=4, input_dim=2, hidden_dim=32, num_layers=3, tile=512, seed=0)
    # 10x10 JSSP instance with tile=128 -> exercises the 2x2 tiled grid, K accumulation
    # and the masked cross-tile BatchNorm reduction (N = 200 padded to 256).
    run_case(B=2, n_j=10, n_m=10, input_dim=2, hidden_dim=32, num_layers=3, tile=128, seed=0)

    print("KERNEL_OK")
</pallas_src>

<mosaic_0001>
module attributes {stable_mosaic.version = 11 : i64} {
  func.func @pool_mlp1_kernel(%arg0: i32, %arg1: i32, %arg2: memref<32x32xbf16, #tpu.memory_space<vmem>>, %arg3: memref<32x128xf32, #tpu.memory_space<vmem>>, %arg4: memref<128x128xf32, #tpu.memory_space<vmem>>, %arg5: memref<1x128xf32, #tpu.memory_space<vmem>>, %arg6: memref<1x128xf32, #tpu.memory_space<vmem>>, %arg7: memref<1x128xf32, #tpu.memory_space<vmem>>, %arg8: memref<32x128xf32, #tpu.memory_space<vmem>>, %arg9: memref<1x2x128xf32, #tpu.memory_space<vmem>>) attributes {dimension_semantics = [#tpu.dimension_semantics<parallel>, #tpu.dimension_semantics<arbitrary>], iteration_bounds = array<i64: 1, 1>, scalar_prefetch = 0 : i64, scratch_operands = 0 : i64, tpu.core_type = #tpu.core_type<tc>, window_params = [{transform_indices = @transform_0, window_bounds = array<i64: 32, 32>}, {pipeline_mode = #tpu.pipeline_mode<synchronous>, transform_indices = @transform_1, window_bounds = array<i64: 32, 128>}, {pipeline_mode = #tpu.pipeline_mode<synchronous>, transform_indices = @transform_2, window_bounds = array<i64: 128, 128>}, {pipeline_mode = #tpu.pipeline_mode<synchronous>, transform_indices = @transform_3, window_bounds = array<i64: 1, 128>}, {pipeline_mode = #tpu.pipeline_mode<synchronous>, transform_indices = @transform_4, window_bounds = array<i64: 1, 128>}, {pipeline_mode = #tpu.pipeline_mode<synchronous>, transform_indices = @transform_5, window_bounds = array<i64: 1, 128>}, {transform_indices = @transform_6, window_bounds = array<i64: 32, 128>}, {transform_indices = @transform_7, window_bounds = array<i64: 1, 2, 128>}]} {
    %c0_i32 = arith.constant 0 : i32
    %0 = arith.cmpi eq, %arg1, %c0_i32 : i32
    %1 = arith.extui %0 : i1 to i32
    %c0_i32_0 = arith.constant 0 : i32
    %2 = arith.cmpi ne, %1, %c0_i32_0 : i32
    scf.if %2 {
      %cst_10 = arith.constant 0.000000e+00 : f32
      %20 = vector.broadcast %cst_10 : f32 to vector<32x128xf32>
      %c0_11 = arith.constant 0 : index
      %c0_12 = arith.constant 0 : index
      %21 = vector.load %arg8[%c0_11, %c0_12] : memref<32x128xf32, #tpu.memory_space<vmem>>, vector<32x128xf32>
      tpu.vector_store %arg8[%c0_11, %c0_12], %20 {strides = array<i32>} : memref<32x128xf32, #tpu.memory_space<vmem>>, vector<32x128xf32>,
    } else {
    }
    %c32_i32 = arith.constant 32 : i32
    %3 = arith.muli %arg1, %c32_i32 : i32
    %4 = arith.index_cast %3 : i32 to index
    %c0 = arith.constant 0 : index
    %5 = vector.load %arg3[%4, %c0] : memref<32x128xf32, #tpu.memory_space<vmem>>, vector<32x128xf32>
    %6 = arith.truncf %5 : vector<32x128xf32> to vector<32x128xbf16>
    %7 = arith.extf %6 : vector<32x128xbf16> to vector<32x128xf32>
    %8 = arith.subf %5, %7 : vector<32x128xf32>
    %9 = arith.truncf %8 : vector<32x128xf32> to vector<32x128xbf16>
    %c0_1 = arith.constant 0 : index
    %c0_2 = arith.constant 0 : index
    %10 = vector.load %arg2[%c0_1, %c0_2] : memref<32x32xbf16, #tpu.memory_space<vmem>>, vector<32x32xbf16>
    %c0_3 = arith.constant 0 : index
    %c0_4 = arith.constant 0 : index
    %11 = vector.load %arg8[%c0_3, %c0_4] : memref<32x128xf32, #tpu.memory_space<vmem>>, vector<32x128xf32>
    %cst = arith.constant dense<0.000000e+00> : vector<32x128xf32>
    %12 = tpu.matmul %10, %6, %cst {dimension_numbers = #tpu.dot_dimension_numbers<[1], [0], [0], [1], [0, 0, 1, 1], [], []>} : vector<32x32xbf16>, vector<32x128xbf16>, vector<32x128xf32> -> vector<32x128xf32>
    %cst_5 = arith.constant dense<0.000000e+00> : vector<32x128xf32>
    %13 = tpu.matmul %10, %9, %cst_5 {dimension_numbers = #tpu.dot_dimension_numbers<[1], [0], [0], [1], [0, 0, 1, 1], [], []>} : vector<32x32xbf16>, vector<32x128xbf16>, vector<32x128xf32> -> vector<32x128xf32>
    %14 = arith.addf %12, %13 : vector<32x128xf32>
    %15 = arith.addf %11, %14 : vector<32x128xf32>
    %c0_6 = arith.constant 0 : index
    %c0_7 = arith.constant 0 : index
    %16 = vector.load %arg8[%c0_6, %c0_7] : memref<32x128xf32, #tpu.memory_space<vmem>>, vector<32x128xf32>
    tpu.vector_store %arg8[%c0_6, %c0_7], %15 {strides = array<i32>} : memref<32x128xf32, #tpu.memory_space<vmem>>, vector<32x128xf32>,
    %c0_i32_8 = arith.constant 0 : i32
    %17 = arith.cmpi eq, %arg1, %c0_i32_8 : i32
    %18 = arith.extui %17 : i1 to i32
    %c0_i32_9 = arith.constant 0 : i32
    %19 = arith.cmpi ne, %18, %c0_i32_9 : i32
    scf.if %19 {
      %c0_10 = arith.constant 0 : index
      %c0_11 = arith.constant 0 : index
      %20 = vector.load %arg8[%c0_10, %c0_11] : memref<32x128xf32, #tpu.memory_space<vmem>>, vector<32x128xf32>
      %c0_12 = arith.constant 0 : index
      %c0_13 = arith.constant 0 : index
      %21 = vector.load %arg4[%c0_12, %c0_13] : memref<128x128xf32, #tpu.memory_space<vmem>>, vector<128x128xf32>
      %cst_14 = arith.constant dense<0.000000e+00> : vector<32x128xf32>
      %22 = tpu.matmul %20, %21, %cst_14 {dimension_numbers = #tpu.dot_dimension_numbers<[1], [0], [0], [1], [0, 0, 1, 1], [], []>} : vector<32x128xf32>, vector<128x128xf32>, vector<32x128xf32> -> vector<32x128xf32>
      %c0_15 = arith.constant 0 : index
      %c0_16 = arith.constant 0 : index
      %23 = vector.load %arg5[%c0_15, %c0_16] : memref<1x128xf32, #tpu.memory_space<vmem>>, vector<1x128xf32>
      %24 = vector.broadcast %23 : vector<1x128xf32> to vector<32x128xf32>
      %25 = arith.addf %22, %24 : vector<32x128xf32>
      %c0_17 = arith.constant 0 : index
      %c0_18 = arith.constant 0 : index
      %26 = vector.load %arg8[%c0_17, %c0_18] : memref<32x128xf32, #tpu.memory_space<vmem>>, vector<32x128xf32>
      tpu.vector_store %arg8[%c0_17, %c0_18], %25 {strides = array<i32>} : memref<32x128xf32, #tpu.memory_space<vmem>>, vector<32x128xf32>,
      %c32_i32_19 = arith.constant 32 : i32
      %27 = arith.muli %arg0, %c32_i32_19 : i32
      %28 = tpu.iota {dimensions = array<i32: 0>} : vector<32x128xi32>
      %29 = vector.broadcast %27 : i32 to vector<32x128xi32>
      %30 = arith.addi %29, %28 : vector<32x128xi32>
      %c32_i32_20 = arith.constant 32 : i32
      %31 = vector.broadcast %c32_i32_20 : i32 to vector<32x128xi32>
      %32 = arith.cmpi slt, %30, %31 : vector<32x128xi32>
      %cst_21 = arith.constant 1.000000e+00 : f32
      %cst_22 = arith.constant 0.000000e+00 : f32
      %33 = vector.broadcast %cst_21 : f32 to vector<32x128xf32>
      %34 = vector.broadcast %cst_22 : f32 to vector<32x128xf32>
      %35 = arith.select %32, %33, %34 : vector<32x128xi1>, vector<32x128xf32>
      %36 = arith.mulf %25, %35 : vector<32x128xf32>
      %cst_23 = arith.constant dense<0.000000e+00> : vector<128xf32>
      %37 = vector.multi_reduction <add>, %36, %cst_23 [0] : vector<32x128xf32> to vector<128xf32>
      %38 = vector.shape_cast %37 : vector<128xf32> to vector<1x128xf32>
      %39 = arith.mulf %36, %25 : vector<32x128xf32>
      %cst_24 = arith.constant dense<0.000000e+00> : vector<128xf32>
      %40 = vector.multi_reduction <add>, %39, %cst_24 [0] : vector<32x128xf32> to vector<128xf32>
      %41 = vector.shape_cast %40 : vector<128xf32> to vector<1x128xf32>
      %42 = tpu.concatenate %38, %41 in 0 : vector<1x128xf32>, vector<1x128xf32> -> vector<2x128xf32>
      %43 = vector.shape_cast %42 : vector<2x128xf32> to vector<1x2x128xf32>
      %c0_25 = arith.constant 0 : index
      %c0_26 = arith.constant 0 : index
      %c0_27 = arith.constant 0 : index
      %44 = vector.load %arg9[%c0_25, %c0_26, %c0_27] : memref<1x2x128xf32, #tpu.memory_space<vmem>>, vector<1x2x128xf32>
      tpu.vector_store %arg9[%c0_25, %c0_26, %c0_27], %43 {strides = array<i32>} : memref<1x2x128xf32, #tpu.memory_space<vmem>>, vector<1x2x128xf32>,
    } else {
    }
    return
  }
  func.func @transform_0(%arg0: i32, %arg1: i32) -> (i32, i32) {
    %c0_i32 = arith.constant 0 : i32
    return %arg0, %arg1 : i32, i32
  }
  func.func @transform_1(%arg0: i32, %arg1: i32) -> (i32, i32) {
    %c0_i32 = arith.constant 0 : i32
    %c0_i32_0 = arith.constant 0 : i32
    %c0_i32_1 = arith.constant 0 : i32
    return %c0_i32, %c0_i32_0 : i32, i32
  }
  func.func @transform_2(%arg0: i32, %arg1: i32) -> (i32, i32) {
    %c0_i32 = arith.constant 0 : i32
    %c0_i32_0 = arith.constant 0 : i32
    %c0_i32_1 = arith.constant 0 : i32
    return %c0_i32, %c0_i32_0 : i32, i32
  }
  func.func @transform_3(%arg0: i32, %arg1: i32) -> (i32, i32) {
    %c0_i32 = arith.constant 0 : i32
    %c0_i32_0 = arith.constant 0 : i32
    %c0_i32_1 = arith.constant 0 : i32
    return %c0_i32, %c0_i32_0 : i32, i32
  }
  func.func @transform_4(%arg0: i32, %arg1: i32) -> (i32, i32) {
    %c0_i32 = arith.constant 0 : i32
    %c0_i32_0 = arith.constant 0 : i32
    %c0_i32_1 = arith.constant 0 : i32
    return %c0_i32, %c0_i32_0 : i32, i32
  }
  func.func @transform_5(%arg0: i32, %arg1: i32) -> (i32, i32) {
    %c0_i32 = arith.constant 0 : i32
    %c0_i32_0 = arith.constant 0 : i32
    %c0_i32_1 = arith.constant 0 : i32
    return %c0_i32, %c0_i32_0 : i32, i32
  }
  func.func @transform_6(%arg0: i32, %arg1: i32) -> (i32, i32) {
    %c0_i32 = arith.constant 0 : i32
    %c0_i32_0 = arith.constant 0 : i32
    return %arg0, %c0_i32 : i32, i32
  }
  func.func @transform_7(%arg0: i32, %arg1: i32) -> (i32, i32, i32) {
    %c0_i32 = arith.constant 0 : i32
    %c0_i32_0 = arith.constant 0 : i32
    %c0_i32_1 = arith.constant 0 : i32
    return %arg0, %c0_i32, %c0_i32_0 : i32, i32, i32
  }
}

</mosaic_0001>

<bundles_post_ra>
// kernel: tpu_custom_call.1
= control target key start
LH: loop header
LB: loop body
LE: loop exit
PB: predicated region body
PF: predicated region fallthrough
CT: control target
= control target key end

     0   :  { %13 = vsyncpa [#allocation3], 0  ;;  %s714_s0 = inlined_call_operand.hbm [shape: bf16[32,32], index: 0, kind: input, shape index: {}]   ;;  %s715_s1 = inlined_call_operand.hbm [shape: f32[32,128], index: 1, kind: input, shape index: {}]   ;;  %s716_s2 = inlined_call_operand.hbm [shape: f32[128,128], index: 2, kind: input, shape index: {}]   ;;  %s717_s3 = inlined_call_operand.vmem [shape: f32[1,128], index: 3, kind: input, shape index: {}]   ;;  %s718_s4 = inlined_call_operand.vmem [shape: f32[1,128], index: 4, kind: input, shape index: {}]   ;;  %s719_s5 = inlined_call_operand.vmem [shape: f32[1,128], index: 5, kind: input, shape index: {}]   ;;  %s720_s6 = inlined_call_operand.hbm [shape: f32[32,128], index: 6, kind: output, shape index: {0}]   ;;  %s721_s7 = inlined_call_operand.hbm [shape: f32[1,2,128], index: 7, kind: output, shape index: {1}]  }
   0x1   :  { %14 = vsyncpa [#allocation6], 0 }
   0x2   :  { %15 = vsyncpa [#allocation4], 0 }
   0x3   :  { %16 = vsyncpa [#allocation10], 0  ;;  %s634_s24 = smov [#allocation5]  }
   0x4   :  { %s34_s25 = sshll.u32 %s634_s24, 4  ;;  %s35_s25 = int_to_ptr.vmem [resolvable:$true] %s34_s25 }
   0x5   :  { %s534_s26 = scalar_lea.vmem %s35_s25, 512  ;;  %p539_p1 = scmp.lt.s32.totalorder %s35_s25, %s35_s25 }
   0x6   :  { %p535_p0 = scmp.ne.s32.totalorder %s35_s25, %s534_s26  ;;  %p540_p2 = scmp.lt.s32.totalorder %s534_s26, %s534_s26 }
   0x8   :  { %p541_p3 = por %p540_p2, %p539_p1 }
   0xa   :  { %p542_p4 = pnand %p541_p3, %p535_p0 }
   0xc   :  { %545 = shalt.err (!%p542_p4)
}
   0xd   :  { %s635_s4 = smov 128   ;;  %s636_s5 = smov 8  }
   0xe   :  { %40 = dma.hbm_to_vmem [thread:$0]  %s715_s1, 512, %s35_s25, [#allocation6], %s635_s4, %s635_s4, %s636_s5  }
   0xf   :  { %s637_s29 = smov [#allocation2]  }
  0x10   :  { %s22_s30 = sshll.u32 %s637_s29, 4  ;;  %s23_s30 = int_to_ptr.vmem [resolvable:$true] %s22_s30 }
  0x11   :  { %s554_s8 = scalar_lea.vmem %s23_s30, 256  ;;  %p559_p6 = scmp.lt.s32.totalorder %s23_s30, %s23_s30 }
  0x12   :  { %p555_p5 = scmp.ne.s32.totalorder %s23_s30, %s554_s8  ;;  %p560_p7 = scmp.lt.s32.totalorder %s554_s8, %s554_s8 }
  0x14   :  { %p561_p8 = por %p560_p7, %p559_p6 }
  0x16   :  { %p562_p9 = pnand %p561_p8, %p555_p5 }
  0x18   :  { %565 = shalt.err (!%p562_p9)
}
  0x19   :  { %s638_s9 = smov 64   ;;  %s639_s10 = smov 4  }
  0x1a   :  { %28 = dma.hbm_to_vmem [thread:$0]  %s714_s0, 256, %s23_s30, [#allocation3], %s638_s9, %s638_s9, %s639_s10  }
  0x1b   :  { %s640_s13 = smov [#allocation7]  }
  0x1c   :  { %s46_s14 = sshll.u32 %s640_s13, 4  ;;  %s47_s14 = int_to_ptr.vmem [resolvable:$true] %s46_s14 }
  0x1d   :  { %s574_s1 = scalar_lea.vmem %s47_s14, 2048  ;;  %p579_p11 = scmp.lt.s32.totalorder %s47_s14, %s47_s14 }
  0x1e   :  { %p575_p10 = scmp.ne.s32.totalorder %s47_s14, %s574_s1  ;;  %p580_p12 = scmp.lt.s32.totalorder %s574_s1, %s574_s1 }
  0x20   :  { %p581_p13 = por %p580_p12, %p579_p11 }
  0x22   :  { %p582_p0 = pnand %p581_p13, %p575_p10 }
  0x24   :  { %585 = shalt.err (!%p582_p0)
}
  0x25   :  { %52 = dma.hbm_to_vmem [thread:$0]  %s716_s2, 2048, %s47_s14, [#allocation6], %s635_s4, %s635_s4, %s636_s5  }
  0x26   :  { %626 = dma.done.wait [#allocation3], 256  }
  0x27   :  { %627 = vsyncadd [#allocation3], 4294967040 }
  0x28   :  { %628 = dma.done.wait [#allocation6], 2560  }
  0x29   :  { %629 = vsyncadd [#allocation6], 4294964736  ;;  %v81_v0 = vld [vmem:[#allocation5 + $0x10] sm:$0xff]  ;;  %v82_v1 = vld [vmem:[#allocation5 + $0x18] sm:$0xff]  ;;  %vm113_vm0 = vcmask 261120   ;;  %s641_s17 = smov [#allocation8]  }
  0x2a   :  { %v79_v2 = vld [vmem:[#allocation5] sm:$0xff]  ;;  %v84_v3 = vpack.c.bf16 %v82_v1, %v81_v0  ;;  %v80_v4 = vld [vmem:[#allocation5 + $0x8] sm:$0xff]  ;;  %v524_v6 = vld [vmem:[#allocation2] sm:$0xff]   ;;  %s398_s18 = sshll.u32 %s641_s17, 4  ;;  %s399_s18 = int_to_ptr.vmem [resolvable:$true] %s398_s18 }
  0x2b   :  { %v83_v5 = vpack.c.bf16 %v80_v4, %v79_v2  ;;  %v248_v9 = vld [vmem:[#allocation7 + $0x78] sm:$0xff]  ;;  %v247_v10 = vld [vmem:[#allocation7 + $0x70] sm:$0xff]  ;;  %464 = vmatprep.mubr.msk.bf16.mxu1 %vm113_vm0, %v524_v6  ;;  %v246_v15 = vld [vmem:[#allocation7 + $0x68] sm:$0xff]  ;;  %p591_p2 = scmp.lt.s32.totalorder %s399_s18, %s399_s18 }
  0x2c   :  { %v87_v7 = vunpack.c.l.bf16 %v84_v3  ;;  %v88_v8 = vunpack.c.h.bf16 %v84_v3  ;;  %476 = vmatprep.subr.mxu0 %v248_v9  ;;  %v525_v20 = vld [vmem:[#allocation2 + $0x8] sm:$0xff]   ;;  %v245_v21 = vld [vmem:[#allocation7 + $0x60] sm:$0xff]  ;;  %v243_v23 = vld [vmem:[#allocation7 + $0x50] sm:$0xff] }
  0x2d   :  { %v85_v11 = vunpack.c.l.bf16 %v83_v5  ;;  %v86_v12 = vunpack.c.h.bf16 %v83_v5  ;;  %477 = vmatpush3.msra.mxu0 %v248_v9  ;;  %v244_v22 = vld [vmem:[#allocation7 + $0x58] sm:$0xff]  ;;  %v242_v24 = vld [vmem:[#allocation7 + $0x48] sm:$0xff]  ;;  %v241_v25 = vld [vmem:[#allocation7 + $0x40] sm:$0xff] }
  0x2e   :  { %v91_v13 = vsub.f32 %v81_v0, %v87_v7  ;;  %v92_v14 = vsub.f32 %v82_v1, %v88_v8  ;;  %478 = vmatprep.subr.mxu0 %v247_v10  ;;  %v240_v26 = vld [vmem:[#allocation7 + $0x38] sm:$0xff]  ;;  %v239_v27 = vld [vmem:[#allocation7 + $0x30] sm:$0xff]  ;;  %v238_v28 = vld [vmem:[#allocation7 + $0x28] sm:$0xff] }
  0x2f   :  { %v89_v16 = vsub.f32 %v79_v2, %v85_v11  ;;  %v90_v17 = vsub.f32 %v80_v4, %v86_v12  ;;  %479 = vmatpush3.msra.mxu0 %v247_v10  ;;  %v237_v29 = vld [vmem:[#allocation7 + $0x20] sm:$0xff]  ;;  %v236_v30 = vld [vmem:[#allocation7 + $0x18] sm:$0xff]  ;;  %v235_v31 = vld [vmem:[#allocation7 + $0x10] sm:$0xff] }
  0x30   :  { %v94_v18 = vpack.c.bf16 %v92_v14, %v91_v13  ;;  %480 = vmatprep.subr.mxu0 %v246_v15  ;;  %v234_v32 = vld [vmem:[#allocation7 + $0x8] sm:$0xff]  ;;  %v233_v33 = vld [vmem:[#allocation7] sm:$0xff]  ;;  %v431_v46 = vld [vmem:[%s717_s3] ss:$0 sm:$0xff]  ;;  %s586_s3 = scalar_lea.vmem %s399_s18, 512 }
  0x31   :  { %v93_v19 = vpack.c.bf16 %v90_v17, %v89_v16  ;;  %481 = vmatpush3.msra.mxu0 %v246_v15  ;;  %p587_p1 = scmp.ne.s32.totalorder %s399_s18, %s586_s3  ;;  %p592_p3 = scmp.lt.s32.totalorder %s586_s3, %s586_s3 }
  0x32   :  { %460 = vmatprep.subr.bf16.mxu1 %v94_v18  ;;  %482 = vmatprep.subr.mxu0 %v245_v21 }
  0x33   :  { %461 = vmatpush3.bf16.msra.mxu1 %v94_v18  ;;  %483 = vmatpush3.msra.mxu0 %v245_v21  ;;  %p593_p4 = por %p592_p3, %p591_p2 }
  0x34   :  { %462 = vmatprep.subr.bf16.mxu1 %v93_v19  ;;  %484 = vmatprep.subr.mxu0 %v244_v22 }
  0x35   :  { %485 = vmatpush3.msra.mxu0 %v244_v22  ;;  %p594_p5 = pnand %p593_p4, %p587_p1 }
  0x36   :  { %486 = vmatprep.subr.mxu0 %v243_v23 }
  0x37   :  { %463 = vmatpush3.bf16.msra.mxu1 %v93_v19  ;;  %487 = vmatpush3.msra.mxu0 %v243_v23 }
  0x38   :  { %468 = vmatprep.subr.bf16.mxu1 %v84_v3  ;;  %488 = vmatprep.subr.mxu0 %v242_v24 }
  0x39   :  { %489 = vmatpush3.msra.mxu0 %v242_v24 }
  0x3a   :  { %465 = vmatmul.mubr.msk.bf16.vlgmr.msra.gmra.mxu1 %vm113_vm0, %v525_v20  ;;  %490 = vmatprep.subr.mxu0 %v241_v25 }
  0x3b   :  { %469 = vmatpush3.bf16.msra.mxu1 %v84_v3  ;;  %472 = vmatprep.mubr.msk.bf16.mxu1 %vm113_vm0, %v524_v6 }
  0x3c   :  { %470 = vmatprep.subr.bf16.mxu1 %v83_v5  ;;  %491 = vmatpush3.msra.mxu0 %v241_v25 }
  0x3d   :  { %492 = vmatprep.subr.mxu0 %v240_v26 }
  0x3e   :  { %493 = vmatpush3.msra.mxu0 %v240_v26 }
  0x3f   :  { %471 = vmatpush3.bf16.msra.mxu1 %v83_v5  ;;  %494 = vmatprep.subr.mxu0 %v239_v27 }
  0x40   :  { %495 = vmatpush3.msra.mxu0 %v239_v27 }
  0x41   :  { %496 = vmatprep.subr.mxu0 %v238_v28 }
  0x42   :  { %473 = vmatmul.mubr.msk.bf16.vlgmr.msra.gmra.mxu1 %vm113_vm0, %v525_v20  ;;  %497 = vmatpush3.msra.mxu0 %v238_v28 }
  0x43   :  { %498 = vmatprep.subr.mxu0 %v237_v29 }
  0x44   :  { %499 = vmatpush3.msra.mxu0 %v237_v29 }
  0x45   :  { %500 = vmatprep.subr.mxu0 %v236_v30 }
  0x46   :  { %501 = vmatpush3.msra.mxu0 %v236_v30 }
  0x47   :  { %502 = vmatprep.subr.mxu0 %v235_v31 }
  0x48   :  { %503 = vmatpush3.msra.mxu0 %v235_v31 }
  0x49   :  { %504 = vmatprep.subr.mxu0 %v234_v32 }
  0x4a   :  { %505 = vmatpush3.msra.mxu0 %v234_v32 }
  0x4b   :  { %506 = vmatprep.subr.mxu0 %v233_v33 }
  0x4c   :  { %507 = vmatpush3.msra.mxu0 %v233_v33 }
  0xfa   :  { %v466_v34 = vpop.f32.mrf.mxu1 }
  0xfc   :  { %v154_v35 = vpop.f32.mrf.mxu1 }
  0xfe   :  { %v467_v36 = vpop.f32.mrf.mxu1 }
 0x100   :  { %v157_v37 = vpop.f32.mrf.mxu1 }
 0x102   :  { %v474_v38 = vpop.f32.mrf.mxu1 }
 0x103   :  { %v212_v42 = vadd.f32 %v474_v38, %v466_v34 }
 0x104   :  { %v203_v39 = vpop.f32.mrf.mxu1 }
 0x105   :  { %v204_v40 = vadd.f32 %v203_v39, %v154_v35 }
 0x106   :  { %v475_v41 = vpop.f32.mrf.mxu1 }
 0x107   :  { %508 = vmatprep.mubr.f32.mxu0 %v204_v40  ;;  %v215_v45 = vadd.f32 %v475_v41, %v467_v36 }
 0x108   :  { %v206_v43 = vpop.f32.mrf.mxu1 }
 0x109   :  { %v207_v44 = vadd.f32 %v206_v43, %v157_v37 }
 0x10b   :  { %509 = vmatmul.mubr.f32.vlgmr.msra.gmra.mxu0 %v207_v44 }
 0x10c   :  { %511 = vmatprep.mubr.f32.mxu0 %v212_v42 }
 0x10f   :  { %512 = vmatmul.mubr.f32.gmra.mxu0 %v215_v45 }
 0x1cb   :  { %v510_v47 = vpop.f32.mrf.mxu0 }
 0x1cc   :  { %v328_v48 = vadd.f32 %v510_v47, %v431_v46 }
 0x1cd   :  { %v322_v49 = vpop.f32.mrf.mxu0 }
 0x1ce   :  { %342 = vst [vmem:[#allocation8 + $0x8] sm:$0xff] %v328_v48  ;;  %v323_v50 = vadd.f32 %v431_v46, %v322_v49  ;;  %v378_v55 = vmul.f32 %v328_v48, %v328_v48 }
 0x1cf   :  { %v513_v51 = vpop.f32.mrf.mxu0 }
 0x1d0   :  { %v377_v52 = vmul.f32 %v323_v50, %v323_v50  ;;  %341 = vst [vmem:[#allocation8] sm:$0xff] %v323_v50  ;;  %v338_v53 = vadd.f32 %v513_v51, %v431_v46  ;;  %v368_v56 = vadd.f32 %v328_v48, %v323_v50 }
 0x1d1   :  { %v332_v54 = vpop.f32.mrf.mxu0 }
 0x1d2   :  { %344 = vst [vmem:[#allocation8 + $0x18] sm:$0xff] %v338_v53  ;;  %v333_v57 = vadd.f32 %v431_v46, %v332_v54  ;;  %v381_v58 = vadd.f32 %v378_v55, %v377_v52 }
 0x1d4   :  { %v369_v59 = vadd.f32 %v368_v56, %v333_v57  ;;  %v379_v60 = vmul.f32 %v333_v57, %v333_v57  ;;  %343 = vst [vmem:[#allocation8 + $0x10] sm:$0xff] %v333_v57 }
 0x1d5   :  { %597 = shalt.err (!%p594_p5)
}
 0x1d6   :  { %404 = dma.vmem_to_hbm [thread:$0]  %s399_s18, 512, %s720_s6, [#allocation4], %s635_s4, %s635_s4, %s636_s5   ;;  %v380_v61 = vmul.f32 %v338_v53, %v338_v53  ;;  %v370_v62 = vadd.f32 %v369_v59, %v338_v53  ;;  %v382_v63 = vadd.f32 %v381_v58, %v379_v60  ;;  %vm390_vm1 = vcmask 1040384  }
 0x1d7   :  { %s642_s21 = smov [#allocation9]  }
 0x1d8   :  { %v371_v0 = vrot.slane %v370_v62, 4  ;;  %v383_v1 = vadd.f32 %v382_v63, %v380_v61  ;;  %s411_s22 = sshll.u32 %s642_s21, 4  ;;  %s412_s22 = int_to_ptr.vmem [resolvable:$true] %s411_s22 }
 0x1d9   :  { %s606_s6 = scalar_lea.vmem %s412_s22, 32  ;;  %p611_p7 = scmp.lt.s32.totalorder %s412_s22, %s412_s22 }
 0x1da   :  { %v372_v2 = vadd.f32 %v371_v0, %v370_v62  ;;  %v384_v3 = vrot.slane %v383_v1, 4  ;;  %p607_p6 = scmp.ne.s32.totalorder %s412_s22, %s606_s6  ;;  %p612_p8 = scmp.lt.s32.totalorder %s606_s6, %s606_s6 }
 0x1dc   :  { %v373_v4 = vrot.slane %v372_v2, 2  ;;  %v385_v5 = vadd.f32 %v384_v3, %v383_v1  ;;  %p613_p9 = por %p612_p8, %p611_p7 }
 0x1de   :  { %v374_v6 = vadd.f32 %v373_v4, %v372_v2  ;;  %v386_v7 = vrot.slane %v385_v5, 2  ;;  %p614_p10 = pnand %p613_p9, %p607_p6 }
 0x1e0   :  { %v375_v8 = vrot.slane %v374_v6, 1  ;;  %v387_v9 = vadd.f32 %v386_v7, %v385_v5 }
 0x1e2   :  { %v388_v10 = vrot.slane %v387_v9, 1  ;;  %v376_v11 = vadd.f32 %v375_v8, %v374_v6 }
 0x1e4   :  { %v389_v12 = vadd.f32 %v388_v10, %v387_v9 }
 0x1e6   :  { %v391_v13 = vsel %vm390_vm1, %v376_v11, %v389_v12 }
 0x1e7   :  { %392 = vst [vmem:[#allocation9] sm:$0x3] %v391_v13 }
 0x1e8   :  { %617 = shalt.err (!%p614_p10)
}
 0x1e9   :  { %414 = dma.vmem_to_hbm [thread:$0]  %s412_s22, 32, %s721_s7, [#allocation10]  }
 0x1ea   :  { %630 = dma.done.wait [#allocation4], 512  }
 0x1eb   :  { %631 = vsyncadd [#allocation4], 4294966784 }
 0x1ec   :  { %632 = dma.done.wait [#allocation10], 32  }
 0x1ed   :  { %633 = vsyncadd [#allocation10], 4294967264 }
 0x1ee   :  { %421 = vsyncpa [#allocation3], 1 }
 0x1ef   :  { %422 = vsyncpa [#allocation6], 1 }
 0x1f0   :  { %423 = vsyncpa [#allocation4], 1 }
 0x1f1   :  { %424 = vsyncpa [#allocation10], 1 }

</bundles_post_ra>
